<compile_context>
chip_gen: v6e
topology: v6e:2x2x1
jax: 0.10.0
libtpu: 0.0.40
codegen_flags: <defaults>
</compile_context>

<pallas_src>
import functools

import numpy as np
import jax
import jax.numpy as jnp
from jax.experimental import pallas as pl
from jax.experimental.pallas import tpu as pltpu

# Exact UNK vector from the module's __init__ (GloVe 6B, 300-d).
_UNK_VEC = np.array([
    0.22418134, -0.28881392, 0.13854356, 0.00365387, -0.12870757, 0.10243822,
    0.061626635, 0.07318011, -0.061350107, -1.3477012, 0.42037755, -0.063593924,
    -0.09683349, 0.18086134, 0.23704372, 0.014126852, 0.170096, -1.1491593,
    0.31497982, 0.06622181, 0.024687296, 0.076693475, 0.13851812, 0.021302193,
    -0.06640582, -0.010336159, 0.13523154, -0.042144544, -0.11938788, 0.006948221,
    0.13333307, -0.18276379, 0.052385733, 0.008943111, -0.23957317, 0.08500333,
    -0.006894406, 0.0015864656, 0.063391194, 0.19177166, -0.13113557, -0.11295479,
    -0.14276934, 0.03413971, -0.034278486, -0.051366422, 0.18891625, -0.16673574,
    -0.057783455, 0.036823478, 0.08078679, 0.022949161, 0.033298038, 0.011784158,
    0.05643189, -0.042776518, 0.011959623, 0.011552498, -0.0007971594, 0.11300405,
    -0.031369694, -0.0061559738, -0.009043574, -0.415336, -0.18870236, 0.13708843,
    0.005911723, -0.113035575, -0.030096142, -0.23908928, -0.05354085, -0.044904727,
    -0.20228513, 0.0065645403, -0.09578946, -0.07391877, -0.06487607, 0.111740574,
    -0.048649278, -0.16565254, -0.052037314, -0.078968436, 0.13684988, 0.0757494,
    -0.006275573, 0.28693774, 0.52017444, -0.0877165, -0.33010918, -0.1359622,
    0.114895485, -0.09744406, 0.06269521, 0.12118575, -0.08026362, 0.35256687,
    -0.060017522, -0.04889904, -0.06828978, 0.088740796, 0.003964443, -0.0766291,
    0.1263925, 0.07809314, -0.023164088, -0.5680669, -0.037892066, -0.1350967,
    -0.11351585, -0.111434504, -0.0905027, 0.25174105, -0.14841858, 0.034635577,
    -0.07334565, 0.06320108, -0.038343467, -0.05413284, 0.042197507, -0.090380974,
    -0.070528865, -0.009174437, 0.009069661, 0.1405178, 0.02958134, -0.036431845,
    -0.08625681, 0.042951006, 0.08230793, 0.0903314, -0.12279937, -0.013899368,
    0.048119213, 0.08678239, -0.14450377, -0.04424887, 0.018319942, 0.015026873,
    -0.100526, 0.06021201, 0.74059093, -0.0016333034, -0.24960588, -0.023739101,
    0.016396184, 0.11928964, 0.13950661, -0.031624354, -0.01645025, 0.14079992,
    -0.0002824564, -0.08052984, -0.0021310581, -0.025350995, 0.086938225, 0.14308536,
    0.17146006, -0.13943303, 0.048792403, 0.09274929, -0.053167373, 0.031103406,
    0.012354865, 0.21057427, 0.32618305, 0.18015954, -0.15881181, 0.15322933,
    -0.22558987, -0.04200665, 0.0084689725, 0.038156632, 0.15188617, 0.13274793,
    0.113756925, -0.095273495, -0.049490947, -0.10265804, -0.27064866, -0.034567792,
    -0.018810693, -0.0010360252, 0.10340131, 0.13883452, 0.21131058, -0.01981019,
    0.1833468, -0.10751636, -0.03128868, 0.02518242, 0.23232952, 0.042052146,
    0.11731903, -0.15506615, 0.0063580726, -0.15429358, 0.1511722, 0.12745973,
    0.2576985, -0.25486213, -0.0709463, 0.17983761, 0.054027, -0.09884228,
    -0.24595179, -0.093028545, -0.028203879, 0.094398156, 0.09233813, 0.029291354,
    0.13110267, 0.15682974, -0.016919162, 0.23927948, -0.1343307, -0.22422817,
    0.14634751, -0.064993896, 0.4703685, -0.027190214, 0.06224946, -0.091360025,
    0.21490277, -0.19562101, -0.10032754, -0.09056772, -0.06203493, -0.18876675,
    -0.10963594, -0.27734384, 0.12616494, -0.02217992, -0.16058226, -0.080475815,
    0.026953284, 0.110732645, 0.014894041, 0.09416802, 0.14299914, -0.1594008,
    -0.066080004, -0.007995227, -0.11668856, -0.13081996, -0.09237365, 0.14741232,
    0.09180138, 0.081735, 0.3211204, -0.0036552632, -0.047030564, -0.02311798,
    0.048961394, 0.08669574, -0.06766279, -0.50028914, -0.048515294, 0.14144728,
    -0.032994404, -0.11954345, -0.14929578, -0.2388355, -0.019883996, -0.15917352,
    -0.052084364, 0.2801028, -0.0029121689, -0.054581646, -0.47385484, 0.17112483,
    -0.12066923, -0.042173345, 0.1395337, 0.26115036, 0.012869649, 0.009291686,
    -0.0026459037, -0.075331464, 0.017840583, -0.26869613, -0.21820338, -0.17084768,
    -0.1022808, -0.055290595, 0.13513643, 0.12362477, -0.10980586, 0.13980341,
    -0.20233242, 0.08813751, 0.3849736, -0.10653763, -0.06199595, 0.028849555,
    0.03230154, 0.023856193, 0.069950655, 0.19310954, -0.077677034, -0.144811,
], dtype=np.float32)

EMB_DIM = int(_UNK_VEC.shape[0])                     # 300 (GloVe 6B-300d)
D_PAD = ((EMB_DIM + 127) // 128) * 128               # 384 = 3 * 128 lanes
VMEM_ROWS_PER_STEP = 8     # small-table fast path (direct vector loads)
HBM_ROWS_PER_STEP = 64     # big-table path (in-flight HBM->VMEM row DMAs)


def _vmem_budgets():
    """Generation-aware (table_threshold_bytes, vmem_limit_bytes)."""
    cap = 128 * 1024 * 1024
    try:
        cap = int(pltpu.get_tpu_info().vmem_capacity_bytes)
    except Exception:
        pass
    if cap <= 64 * 1024 * 1024:
        # v7x: 64 MiB VMEM per TensorCore -> single-buffered table <= ~28 MiB,
        # compiler limit <= ~52 MiB leaves headroom for pipelined out blocks.
        return 28 * 1024 * 1024, 52 * 1024 * 1024
    # v5e / v6e: 128 MiB VMEM.
    return 56 * 1024 * 1024, 100 * 1024 * 1024


def pad_table(table: jax.Array) -> jax.Array:
    """Pad (vocab+1, 300) -> (mult-of-8, 384) so every row access is lane-dense."""
    v, d = table.shape
    v_pad = ((v + 7) // 8) * 8
    d_pad = ((d + 127) // 128) * 128
    return jnp.pad(table, ((0, v_pad - v), (0, d_pad - d)))


def _vmem_gather_kernel(idx_ref, table_ref, out_ref, *, rows_per_step):
    """Small-table path: whole table resident in VMEM (single-buffered); gather
    rows with direct dynamic vector loads/stores (no DMA descriptors)."""
    base = pl.multiple_of(pl.program_id(0) * rows_per_step, rows_per_step)
    for r in range(rows_per_step):
        row = idx_ref[base + r]
        out_ref[pl.ds(r, 1), :] = table_ref[pl.ds(row, 1), :]


def _hbm_gather_kernel(idx_ref, seq_ref, table_ref, out_ref, sems, *,
                       rows_per_step):
    """Big-table path: table stays in HBM; rows are DMA'd HBM -> pipelined VMEM
    output block.  All valid rows' copies are put in flight before any wait, and
    rows past the true sequence length (power-of-two bucket padding) are skipped.
    """
    base = pl.multiple_of(pl.program_id(0) * rows_per_step, rows_per_step)
    n_valid = jnp.maximum(jnp.minimum(rows_per_step, seq_ref[0] - base), 0)

    @pl.loop(0, n_valid)
    def _(r):                                   # issue: up to rows_per_step in flight
        row = idx_ref[base + r]
        pltpu.make_async_copy(table_ref.at[pl.ds(row, 1)],
                              out_ref.at[pl.ds(r, 1)],
                              sems.at[r]).start()

    @pl.loop(0, n_valid)
    def _(r):                                   # drain
        row = idx_ref[base + r]
        pltpu.make_async_copy(table_ref.at[pl.ds(row, 1)],
                              out_ref.at[pl.ds(r, 1)],
                              sems.at[r]).wait()


def glove_lookup(table_padded: jax.Array, indices: jax.Array, *,
                 force_hbm_gather: bool = False) -> jax.Array:
    """Pallas embedding gather: out[s, :] = table[indices[s], :EMB_DIM]."""
    v_pad, d_pad = table_padded.shape
    assert v_pad % 8 == 0 and d_pad % 128 == 0, (v_pad, d_pad)
    seq = int(indices.shape[0])

    # Clip so a bad index can never become an OOB DMA / load source.
    idx = jnp.clip(indices.astype(jnp.int32), 0, v_pad - 1)

    table_threshold, vmem_limit = _vmem_budgets()
    table_bytes = v_pad * d_pad * table_padded.dtype.itemsize
    use_vmem_path = (not force_hbm_gather) and table_bytes <= table_threshold
    rows = VMEM_ROWS_PER_STEP if use_vmem_path else HBM_ROWS_PER_STEP

    # Bucket grid length to powers of two so distinct sentence lengths map onto
    # a small set of compiled kernels (avoid per-length recompiles).
    n_steps = max(1, -(-seq // rows))
    n_steps = 1 << (n_steps - 1).bit_length()
    s_pad = n_steps * rows
    idx_pad = jnp.zeros((s_pad,), jnp.int32).at[:seq].set(idx)

    if use_vmem_path:
        def call_vmem(table_spec):
            return pl.pallas_call(
                functools.partial(_vmem_gather_kernel, rows_per_step=rows),
                out_shape=jax.ShapeDtypeStruct((s_pad, d_pad), table_padded.dtype),
                grid_spec=pltpu.PrefetchScalarGridSpec(
                    num_scalar_prefetch=1,
                    grid=(n_steps,),
                    in_specs=[table_spec],
                    out_specs=pl.BlockSpec((rows, d_pad), lambda i, ix: (i, 0)),
                ),
                compiler_params=pltpu.CompilerParams(
                    dimension_semantics=("parallel",),
                    vmem_limit_bytes=vmem_limit),
            )(idx_pad, table_padded)

        try:
            # Whole table resident in VMEM, single-buffered (no block pipeline).
            out = call_vmem(pl.BlockSpec(memory_space=pltpu.MemorySpace.VMEM))
        except Exception:
            # Fallback: constant-index resident block (previously validated path).
            out = call_vmem(pl.BlockSpec((v_pad, d_pad), lambda i, ix: (0, 0)))
    else:
        seq_arr = jnp.array([seq], dtype=jnp.int32)
        out = pl.pallas_call(
            functools.partial(_hbm_gather_kernel, rows_per_step=rows),
            out_shape=jax.ShapeDtypeStruct((s_pad, d_pad), table_padded.dtype),
            grid_spec=pltpu.PrefetchScalarGridSpec(
                num_scalar_prefetch=2,
                grid=(n_steps,),
                in_specs=[pl.BlockSpec(memory_space=pl.ANY)],
                out_specs=pl.BlockSpec((rows, d_pad), lambda i, ix, sq: (i, 0)),
                scratch_shapes=[pltpu.SemaphoreType.DMA((rows,))],
            ),
            compiler_params=pltpu.CompilerParams(
                dimension_semantics=("parallel",)),
        )(idx_pad, seq_arr, table_padded)

    # Strip seq padding and the 300 -> 384 lane padding.
    return out[:seq, :EMB_DIM]


class GloveModel:
    """JAX/Pallas equivalent of the PyTorch GloveModel."""

    def __init__(self, vocab_words, key):
        # TODO(synk): real module loads pretrained 400k-word GloVe('6B')
        # vectors + stoi; a small deterministic random table stands in here.
        self.emb_dict = {w: i for i, w in enumerate(vocab_words)}
        self.unk_index = len(vocab_words)
        vectors = jax.random.normal(key, (len(vocab_words), EMB_DIM),
                                    dtype=jnp.float32)
        # torch.vstack([glove.vectors, unk])
        self.table = jnp.vstack([vectors, jnp.asarray(_UNK_VEC)[None, :]])
        # Lane/sublane-padded copy used by the kernel; built once, not per call.
        self.table_padded = pad_table(self.table)

    def indices_for(self, sentence):
        # Host-side word -> index mapping (mirrors the torch code exactly).
        return np.array(
            [self.emb_dict[w.lower()] if w.lower() in self.emb_dict
             else self.unk_index for w in sentence], dtype=np.int32)

    def forward(self, sentence):
        idx = self.indices_for(sentence)
        return glove_lookup(self.table_padded, jnp.asarray(idx))


if __name__ == "__main__":
    key = jax.random.PRNGKey(0)

    # Small deterministic vocab of 50 words; table is (51, 300) incl. UNK row.
    vocab_words = [f"word{i}" for i in range(50)]
    model = GloveModel(vocab_words, key)
    table_np = np.asarray(model.table)

    # Sentence of 8 tokens: known words (various cases) + OOV words.
    sentence = ["Word3", "word17", "zzz_unknown", "WORD0",
                "word49", "mystery", "word25", "word8"]
    idx_np = model.indices_for(sentence)
    ref = table_np[idx_np]

    # Default dispatch (small table -> VMEM-resident vector-load fast path).
    out = jax.block_until_ready(model.forward(sentence))
    assert out.shape == (len(sentence), EMB_DIM), out.shape
    assert out.dtype == jnp.float32, out.dtype
    np.testing.assert_allclose(np.asarray(out), ref, rtol=0, atol=0)

    # Force the HBM DMA-gather path (the one the real 400k-row table uses).
    out_hbm = jax.block_until_ready(
        glove_lookup(model.table_padded, jnp.asarray(idx_np),
                     force_hbm_gather=True))
    np.testing.assert_allclose(np.asarray(out_hbm), ref, rtol=0, atol=0)

    # Longer sentence exercising multiple grid steps + seq padding/bucketing.
    long_sentence = [f"word{(7 * i) % 50}" if i % 3 else "oov_token"
                     for i in range(37)]
    long_idx = model.indices_for(long_sentence)
    long_ref = table_np[long_idx]

    out_long = jax.block_until_ready(model.forward(long_sentence))
    np.testing.assert_allclose(np.asarray(out_long), long_ref, rtol=0, atol=0)

    out_long_hbm = jax.block_until_ready(
        glove_lookup(model.table_padded, jnp.asarray(long_idx),
                     force_hbm_gather=True))
    np.testing.assert_allclose(np.asarray(out_long_hbm), long_ref, rtol=0, atol=0)

    # Even longer sentence: multiple HBM grid steps including a partial and a
    # fully-padded step (exercises the seq-length guard).
    very_long = [f"word{(11 * i) % 50}" if i % 5 else "unknown_tok"
                 for i in range(150)]
    vl_idx = model.indices_for(very_long)
    vl_ref = table_np[vl_idx]

    out_vl = jax.block_until_ready(model.forward(very_long))
    np.testing.assert_allclose(np.asarray(out_vl), vl_ref, rtol=0, atol=0)

    out_vl_hbm = jax.block_until_ready(
        glove_lookup(model.table_padded, jnp.asarray(vl_idx),
                     force_hbm_gather=True))
    np.testing.assert_allclose(np.asarray(out_vl_hbm), vl_ref, rtol=0, atol=0)

    print("KERNEL_OK")
</pallas_src>

<mosaic_0001>
module attributes {stable_mosaic.version = 11 : i64} {
  func.func @_vmem_gather_kernel(%arg0: i32, %arg1: memref<8xi32, #tpu.memory_space<smem>>, %arg2: memref<56x384xf32, #tpu.memory_space<vmem>>, %arg3: memref<8x384xf32, #tpu.memory_space<vmem>>) attributes {dimension_semantics = [#tpu.dimension_semantics<parallel>], iteration_bounds = array<i64: 1>, scalar_prefetch = 1 : i64, scratch_operands = 0 : i64, tpu.core_type = #tpu.core_type<tc>, window_params = [{pipeline_mode = #tpu.pipeline_mode<synchronous>, transform_indices = @transform_0, window_bounds = array<i64: 56, 384>}, {transform_indices = @transform_1, window_bounds = array<i64: 8, 384>}]} {
    %c8_i32 = arith.constant 8 : i32
    %0 = arith.muli %arg0, %c8_i32 : i32
    %1 = tpu.assume_multiple %0, 8 : i32
    %c0_i32 = arith.constant 0 : i32
    %2 = arith.addi %1, %c0_i32 : i32
    %3 = arith.index_cast %2 : i32 to index
    %4 = memref.load %arg1[%3] : memref<8xi32, #tpu.memory_space<smem>>
    %5 = arith.index_cast %4 : i32 to index
    %c0 = arith.constant 0 : index
    %6 = vector.load %arg2[%5, %c0] : memref<56x384xf32, #tpu.memory_space<vmem>>, vector<1x384xf32>
    %c0_0 = arith.constant 0 : index
    %c0_1 = arith.constant 0 : index
    %7 = vector.load %arg3[%c0_0, %c0_1] : memref<8x384xf32, #tpu.memory_space<vmem>>, vector<1x384xf32>
    tpu.vector_store %arg3[%c0_0, %c0_1], %6 {strides = array<i32>} : memref<8x384xf32, #tpu.memory_space<vmem>>, vector<1x384xf32>,
    %c1_i32 = arith.constant 1 : i32
    %8 = arith.addi %1, %c1_i32 : i32
    %9 = arith.index_cast %8 : i32 to index
    %10 = memref.load %arg1[%9] : memref<8xi32, #tpu.memory_space<smem>>
    %11 = arith.index_cast %10 : i32 to index
    %c0_2 = arith.constant 0 : index
    %12 = vector.load %arg2[%11, %c0_2] : memref<56x384xf32, #tpu.memory_space<vmem>>, vector<1x384xf32>
    %c1 = arith.constant 1 : index
    %c0_3 = arith.constant 0 : index
    %13 = vector.load %arg3[%c1, %c0_3] : memref<8x384xf32, #tpu.memory_space<vmem>>, vector<1x384xf32>
    tpu.vector_store %arg3[%c1, %c0_3], %12 {strides = array<i32>} : memref<8x384xf32, #tpu.memory_space<vmem>>, vector<1x384xf32>,
    %c2_i32 = arith.constant 2 : i32
    %14 = arith.addi %1, %c2_i32 : i32
    %15 = arith.index_cast %14 : i32 to index
    %16 = memref.load %arg1[%15] : memref<8xi32, #tpu.memory_space<smem>>
    %17 = arith.index_cast %16 : i32 to index
    %c0_4 = arith.constant 0 : index
    %18 = vector.load %arg2[%17, %c0_4] : memref<56x384xf32, #tpu.memory_space<vmem>>, vector<1x384xf32>
    %c2 = arith.constant 2 : index
    %c0_5 = arith.constant 0 : index
    %19 = vector.load %arg3[%c2, %c0_5] : memref<8x384xf32, #tpu.memory_space<vmem>>, vector<1x384xf32>
    tpu.vector_store %arg3[%c2, %c0_5], %18 {strides = array<i32>} : memref<8x384xf32, #tpu.memory_space<vmem>>, vector<1x384xf32>,
    %c3_i32 = arith.constant 3 : i32
    %20 = arith.addi %1, %c3_i32 : i32
    %21 = arith.index_cast %20 : i32 to index
    %22 = memref.load %arg1[%21] : memref<8xi32, #tpu.memory_space<smem>>
    %23 = arith.index_cast %22 : i32 to index
    %c0_6 = arith.constant 0 : index
    %24 = vector.load %arg2[%23, %c0_6] : memref<56x384xf32, #tpu.memory_space<vmem>>, vector<1x384xf32>
    %c3 = arith.constant 3 : index
    %c0_7 = arith.constant 0 : index
    %25 = vector.load %arg3[%c3, %c0_7] : memref<8x384xf32, #tpu.memory_space<vmem>>, vector<1x384xf32>
    tpu.vector_store %arg3[%c3, %c0_7], %24 {strides = array<i32>} : memref<8x384xf32, #tpu.memory_space<vmem>>, vector<1x384xf32>,
    %c4_i32 = arith.constant 4 : i32
    %26 = arith.addi %1, %c4_i32 : i32
    %27 = arith.index_cast %26 : i32 to index
    %28 = memref.load %arg1[%27] : memref<8xi32, #tpu.memory_space<smem>>
    %29 = arith.index_cast %28 : i32 to index
    %c0_8 = arith.constant 0 : index
    %30 = vector.load %arg2[%29, %c0_8] : memref<56x384xf32, #tpu.memory_space<vmem>>, vector<1x384xf32>
    %c4 = arith.constant 4 : index
    %c0_9 = arith.constant 0 : index
    %31 = vector.load %arg3[%c4, %c0_9] : memref<8x384xf32, #tpu.memory_space<vmem>>, vector<1x384xf32>
    tpu.vector_store %arg3[%c4, %c0_9], %30 {strides = array<i32>} : memref<8x384xf32, #tpu.memory_space<vmem>>, vector<1x384xf32>,
    %c5_i32 = arith.constant 5 : i32
    %32 = arith.addi %1, %c5_i32 : i32
    %33 = arith.index_cast %32 : i32 to index
    %34 = memref.load %arg1[%33] : memref<8xi32, #tpu.memory_space<smem>>
    %35 = arith.index_cast %34 : i32 to index
    %c0_10 = arith.constant 0 : index
    %36 = vector.load %arg2[%35, %c0_10] : memref<56x384xf32, #tpu.memory_space<vmem>>, vector<1x384xf32>
    %c5 = arith.constant 5 : index
    %c0_11 = arith.constant 0 : index
    %37 = vector.load %arg3[%c5, %c0_11] : memref<8x384xf32, #tpu.memory_space<vmem>>, vector<1x384xf32>
    tpu.vector_store %arg3[%c5, %c0_11], %36 {strides = array<i32>} : memref<8x384xf32, #tpu.memory_space<vmem>>, vector<1x384xf32>,
    %c6_i32 = arith.constant 6 : i32
    %38 = arith.addi %1, %c6_i32 : i32
    %39 = arith.index_cast %38 : i32 to index
    %40 = memref.load %arg1[%39] : memref<8xi32, #tpu.memory_space<smem>>
    %41 = arith.index_cast %40 : i32 to index
    %c0_12 = arith.constant 0 : index
    %42 = vector.load %arg2[%41, %c0_12] : memref<56x384xf32, #tpu.memory_space<vmem>>, vector<1x384xf32>
    %c6 = arith.constant 6 : index
    %c0_13 = arith.constant 0 : index
    %43 = vector.load %arg3[%c6, %c0_13] : memref<8x384xf32, #tpu.memory_space<vmem>>, vector<1x384xf32>
    tpu.vector_store %arg3[%c6, %c0_13], %42 {strides = array<i32>} : memref<8x384xf32, #tpu.memory_space<vmem>>, vector<1x384xf32>,
    %c7_i32 = arith.constant 7 : i32
    %44 = arith.addi %1, %c7_i32 : i32
    %45 = arith.index_cast %44 : i32 to index
    %46 = memref.load %arg1[%45] : memref<8xi32, #tpu.memory_space<smem>>
    %47 = arith.index_cast %46 : i32 to index
    %c0_14 = arith.constant 0 : index
    %48 = vector.load %arg2[%47, %c0_14] : memref<56x384xf32, #tpu.memory_space<vmem>>, vector<1x384xf32>
    %c7 = arith.constant 7 : index
    %c0_15 = arith.constant 0 : index
    %49 = vector.load %arg3[%c7, %c0_15] : memref<8x384xf32, #tpu.memory_space<vmem>>, vector<1x384xf32>
    tpu.vector_store %arg3[%c7, %c0_15], %48 {strides = array<i32>} : memref<8x384xf32, #tpu.memory_space<vmem>>, vector<1x384xf32>,
    return
  }
  func.func @transform_0(%arg0: i32, %arg1: memref<8xi32, #tpu.memory_space<smem>>) -> (i32, i32) {
    %c0_i32 = arith.constant 0 : i32
    %c0_i32_0 = arith.constant 0 : i32
    %c0_i32_1 = arith.constant 0 : i32
    return %c0_i32, %c0_i32_0 : i32, i32
  }
  func.func @transform_1(%arg0: i32, %arg1: memref<8xi32, #tpu.memory_space<smem>>) -> (i32, i32) {
    %c0_i32 = arith.constant 0 : i32
    %c0_i32_0 = arith.constant 0 : i32
    return %arg0, %c0_i32 : i32, i32
  }
}

module attributes {stable_mosaic.version = 11 : i64} {
  func.func @_vmem_gather_kernel(%arg0: i32, %arg1: memref<8xi32, #tpu.memory_space<smem>>, %arg2: memref<56x384xf32, #tpu.memory_space<vmem>>, %arg3: memref<8x384xf32, #tpu.memory_space<vmem>>) attributes {dimension_semantics = [#tpu.dimension_semantics<parallel>], iteration_bounds = array<i64: 1>, scalar_prefetch = 1 : i64, scratch_operands = 0 : i64, tpu.core_type = #tpu.core_type<tc>, window_params = [{pipeline_mode = #tpu.pipeline_mode<synchronous>, transform_indices = @transform_0, window_bounds = array<i64: 56, 384>}, {transform_indices = @transform_1, window_bounds = array<i64: 8, 384>}]} {
    %c8_i32 = arith.constant 8 : i32
    %0 = arith.muli %arg0, %c8_i32 : i32
    %1 = tpu.assume_multiple %0, 8 : i32
    %c0_i32 = arith.constant 0 : i32
    %2 = arith.addi %1, %c0_i32 : i32
    %3 = arith.index_cast %2 : i32 to index
    %4 = memref.load %arg1[%3] : memref<8xi32, #tpu.memory_space<smem>>
    %5 = arith.index_cast %4 : i32 to index
    %c0 = arith.constant 0 : index
    %6 = vector.load %arg2[%5, %c0] : memref<56x384xf32, #tpu.memory_space<vmem>>, vector<1x384xf32>
    %c0_0 = arith.constant 0 : index
    %c0_1 = arith.constant 0 : index
    %7 = vector.load %arg3[%c0_0, %c0_1] : memref<8x384xf32, #tpu.memory_space<vmem>>, vector<1x384xf32>
    tpu.vector_store %arg3[%c0_0, %c0_1], %6 {strides = array<i32>} : memref<8x384xf32, #tpu.memory_space<vmem>>, vector<1x384xf32>,
    %c1_i32 = arith.constant 1 : i32
    %8 = arith.addi %1, %c1_i32 : i32
    %9 = arith.index_cast %8 : i32 to index
    %10 = memref.load %arg1[%9] : memref<8xi32, #tpu.memory_space<smem>>
    %11 = arith.index_cast %10 : i32 to index
    %c0_2 = arith.constant 0 : index
    %12 = vector.load %arg2[%11, %c0_2] : memref<56x384xf32, #tpu.memory_space<vmem>>, vector<1x384xf32>
    %c1 = arith.constant 1 : index
    %c0_3 = arith.constant 0 : index
    %13 = vector.load %arg3[%c1, %c0_3] : memref<8x384xf32, #tpu.memory_space<vmem>>, vector<1x384xf32>
    tpu.vector_store %arg3[%c1, %c0_3], %12 {strides = array<i32>} : memref<8x384xf32, #tpu.memory_space<vmem>>, vector<1x384xf32>,
    %c2_i32 = arith.constant 2 : i32
    %14 = arith.addi %1, %c2_i32 : i32
    %15 = arith.index_cast %14 : i32 to index
    %16 = memref.load %arg1[%15] : memref<8xi32, #tpu.memory_space<smem>>
    %17 = arith.index_cast %16 : i32 to index
    %c0_4 = arith.constant 0 : index
    %18 = vector.load %arg2[%17, %c0_4] : memref<56x384xf32, #tpu.memory_space<vmem>>, vector<1x384xf32>
    %c2 = arith.constant 2 : index
    %c0_5 = arith.constant 0 : index
    %19 = vector.load %arg3[%c2, %c0_5] : memref<8x384xf32, #tpu.memory_space<vmem>>, vector<1x384xf32>
    tpu.vector_store %arg3[%c2, %c0_5], %18 {strides = array<i32>} : memref<8x384xf32, #tpu.memory_space<vmem>>, vector<1x384xf32>,
    %c3_i32 = arith.constant 3 : i32
    %20 = arith.addi %1, %c3_i32 : i32
    %21 = arith.index_cast %20 : i32 to index
    %22 = memref.load %arg1[%21] : memref<8xi32, #tpu.memory_space<smem>>
    %23 = arith.index_cast %22 : i32 to index
    %c0_6 = arith.constant 0 : index
    %24 = vector.load %arg2[%23, %c0_6] : memref<56x384xf32, #tpu.memory_space<vmem>>, vector<1x384xf32>
    %c3 = arith.constant 3 : index
    %c0_7 = arith.constant 0 : index
    %25 = vector.load %arg3[%c3, %c0_7] : memref<8x384xf32, #tpu.memory_space<vmem>>, vector<1x384xf32>
    tpu.vector_store %arg3[%c3, %c0_7], %24 {strides = array<i32>} : memref<8x384xf32, #tpu.memory_space<vmem>>, vector<1x384xf32>,
    %c4_i32 = arith.constant 4 : i32
    %26 = arith.addi %1, %c4_i32 : i32
    %27 = arith.index_cast %26 : i32 to index
    %28 = memref.load %arg1[%27] : memref<8xi32, #tpu.memory_space<smem>>
    %29 = arith.index_cast %28 : i32 to index
    %c0_8 = arith.constant 0 : index
    %30 = vector.load %arg2[%29, %c0_8] : memref<56x384xf32, #tpu.memory_space<vmem>>, vector<1x384xf32>
    %c4 = arith.constant 4 : index
    %c0_9 = arith.constant 0 : index
    %31 = vector.load %arg3[%c4, %c0_9] : memref<8x384xf32, #tpu.memory_space<vmem>>, vector<1x384xf32>
    tpu.vector_store %arg3[%c4, %c0_9], %30 {strides = array<i32>} : memref<8x384xf32, #tpu.memory_space<vmem>>, vector<1x384xf32>,
    %c5_i32 = arith.constant 5 : i32
    %32 = arith.addi %1, %c5_i32 : i32
    %33 = arith.index_cast %32 : i32 to index
    %34 = memref.load %arg1[%33] : memref<8xi32, #tpu.memory_space<smem>>
    %35 = arith.index_cast %34 : i32 to index
    %c0_10 = arith.constant 0 : index
    %36 = vector.load %arg2[%35, %c0_10] : memref<56x384xf32, #tpu.memory_space<vmem>>, vector<1x384xf32>
    %c5 = arith.constant 5 : index
    %c0_11 = arith.constant 0 : index
    %37 = vector.load %arg3[%c5, %c0_11] : memref<8x384xf32, #tpu.memory_space<vmem>>, vector<1x384xf32>
    tpu.vector_store %arg3[%c5, %c0_11], %36 {strides = array<i32>} : memref<8x384xf32, #tpu.memory_space<vmem>>, vector<1x384xf32>,
    %c6_i32 = arith.constant 6 : i32
    %38 = arith.addi %1, %c6_i32 : i32
    %39 = arith.index_cast %38 : i32 to index
    %40 = memref.load %arg1[%39] : memref<8xi32, #tpu.memory_space<smem>>
    %41 = arith.index_cast %40 : i32 to index
    %c0_12 = arith.constant 0 : index
    %42 = vector.load %arg2[%41, %c0_12] : memref<56x384xf32, #tpu.memory_space<vmem>>, vector<1x384xf32>
    %c6 = arith.constant 6 : index
    %c0_13 = arith.constant 0 : index
    %43 = vector.load %arg3[%c6, %c0_13] : memref<8x384xf32, #tpu.memory_space<vmem>>, vector<1x384xf32>
    tpu.vector_store %arg3[%c6, %c0_13], %42 {strides = array<i32>} : memref<8x384xf32, #tpu.memory_space<vmem>>, vector<1x384xf32>,
    %c7_i32 = arith.constant 7 : i32
    %44 = arith.addi %1, %c7_i32 : i32
    %45 = arith.index_cast %44 : i32 to index
    %46 = memref.load %arg1[%45] : memref<8xi32, #tpu.memory_space<smem>>
    %47 = arith.index_cast %46 : i32 to index
    %c0_14 = arith.constant 0 : index
    %48 = vector.load %arg2[%47, %c0_14] : memref<56x384xf32, #tpu.memory_space<vmem>>, vector<1x384xf32>
    %c7 = arith.constant 7 : index
    %c0_15 = arith.constant 0 : index
    %49 = vector.load %arg3[%c7, %c0_15] : memref<8x384xf32, #tpu.memory_space<vmem>>, vector<1x384xf32>
    tpu.vector_store %arg3[%c7, %c0_15], %48 {strides = array<i32>} : memref<8x384xf32, #tpu.memory_space<vmem>>, vector<1x384xf32>,
    return
  }
  func.func @transform_0(%arg0: i32, %arg1: memref<8xi32, #tpu.memory_space<smem>>) -> (i32, i32) {
    %c0_i32 = arith.constant 0 : i32
    %c0_i32_0 = arith.constant 0 : i32
    %c0_i32_1 = arith.constant 0 : i32
    return %c0_i32, %c0_i32_0 : i32, i32
  }
  func.func @transform_1(%arg0: i32, %arg1: memref<8xi32, #tpu.memory_space<smem>>) -> (i32, i32) {
    %c0_i32 = arith.constant 0 : i32
    %c0_i32_0 = arith.constant 0 : i32
    return %arg0, %c0_i32 : i32, i32
  }
}

</mosaic_0001>

<bundles_post_ra>
// kernel: tpu_custom_call.1
= control target key start
LH: loop header
LB: loop body
LE: loop exit
PB: predicated region body
PF: predicated region fallthrough
CT: control target
= control target key end

     0   :  { %s256_s9 = smov [#allocation3]   ;;  %s313_s0 = inlined_call_operand.hbm [shape: s32[8], index: 0, kind: input, shape index: {}]   ;;  %s314_s1 = inlined_call_operand.hbm [shape: f32[56,384], index: 1, kind: input, shape index: {}]   ;;  %s315_s2 = inlined_call_operand.hbm [shape: f32[8,384], index: 2, kind: output, shape index: {}]  }
   0x1   :  { %8 = dma.hbm_to_smem %s313_s0, 16, %s256_s9, [#allocation2] }
   0x2   :  { %250 = dma.done.wait [#allocation2], 16 }
   0x3   :  { %251 = vsyncadd [#allocation2], 4294967280 }
   0x4   :  { %10 = sfence }
   0x5   :  { %11 = vsyncpa [#allocation5], 0 }
   0x6   :  { %12 = vsyncpa [#allocation6], 0  ;;  %s257_s12 = smov [#allocation4]  }
   0x7   :  { %s18_s13 = sshll.u32 %s257_s12, 4  ;;  %s19_s13 = int_to_ptr.vmem [resolvable:$true] %s18_s13 }
   0x8   :  { %s218_s14 = scalar_lea.vmem %s19_s13, 2688  ;;  %p223_p1 = scmp.lt.s32.totalorder %s19_s13, %s19_s13 }
   0x9   :  { %p219_p0 = scmp.ne.s32.totalorder %s19_s13, %s218_s14  ;;  %p224_p2 = scmp.lt.s32.totalorder %s218_s14, %s218_s14 }
   0xb   :  { %p225_p3 = por %p224_p2, %p223_p1 }
   0xd   :  { %p226_p4 = pnand %p225_p3, %p219_p0 }
   0xf   :  { %229 = shalt.err (!%p226_p4)
}
  0x10   :  { %s258_s15 = smov 384   ;;  %s259_s16 = smov 24  }
  0x11   :  { %24 = dma.hbm_to_vmem [thread:$0]  %s314_s1, 2688, %s19_s13, [#allocation5], %s258_s15, %s258_s15, %s259_s16  }
  0x12   :  { %252 = dma.done.wait [#allocation5], 2688  }
  0x13   :  { %253 = vsyncadd [#allocation5], 4294964608  ;;  %s29_s0 = sld [smem:[#allocation3]]  ;;  %v39_v0 = vlaneseq }
  0x14   :  { %s183_s19 = sld [smem:[#allocation3 + $0x1]] }
  0x15   :  { %s185_s20 = sld [smem:[#allocation3 + $0x2]]  ;;  %vm286_vm0 = vcmp.lt.s32.totalorder %v39_v0, 384 }
  0x16   :  { %s187_s21 = sld [smem:[#allocation3 + $0x3]] }
  0x17   :  { %s282_s22 = sld [smem:[#allocation3 + $0x4]] }
  0x18   :  { %s284_s23 = sld [smem:[#allocation3 + $0x5]] }
  0x19   :  { %s30_s24 = sshra.s32 %s29_s0, 3  ;;  %s33_s25 = sand.u32 7, %s29_s0 }
  0x1a   :  { %s182_s26 = smul.u32 24, %s30_s24  ;;  %s47_s27 = sshra.s32 %s183_s19, 3 }
  0x1b   :  { %s50_s28 = sand.u32 7, %s183_s19  ;;  %s184_s29 = smul.u32 24, %s47_s27 }
  0x1c   :  { %s36_s30 = sadd.s32 %s182_s26, %s33_s25  ;;  %s61_s1 = sshra.s32 %s185_s20, 3 }
  0x1d   :  { %s53_s3 = sadd.s32 %s184_s29, %s50_s28  ;;  %s37_s4 = scalar_lea.vmem [#allocation4], %s36_s30 }
  0x1e   :  { %v38_v2 = vld [vmem:[%s37_s4] ss:$8 sm:$0x7]  ;;  %s64_s5 = sand.u32 7, %s185_s20  ;;  %s54_s6 = scalar_lea.vmem [#allocation4], %s53_s3 }
  0x1f   :  { %43 = vst.msk [vmem:[#allocation7] ss:$8 sm:$0x7] %vm286_vm0, %v38_v2  ;;  %v55_v3 = vld [vmem:[%s54_s6] ss:$8 sm:$0x7] }
  0x20   :  { %s186_s7 = smul.u32 24, %s61_s1  ;;  %s75_s8 = sshra.s32 %s187_s21, 3  ;;  %57 = vst.msk [vmem:[#allocation7 + $0x1] ss:$8 sm:$0x7] %vm286_vm0, %v55_v3 }
  0x21   :  { %s78_s9 = sand.u32 7, %s187_s21  ;;  %s188_s10 = smul.u32 24, %s75_s8 }
  0x22   :  { %s67_s11 = sadd.s32 %s186_s7, %s64_s5  ;;  %s89_s12 = sshra.s32 %s282_s22, 3 }
  0x23   :  { %s81_s13 = sadd.s32 %s188_s10, %s78_s9  ;;  %s68_s14 = scalar_lea.vmem [#allocation4], %s67_s11 }
  0x24   :  { %v69_v4 = vld [vmem:[%s68_s14] ss:$8 sm:$0x7]  ;;  %s92_s15 = sand.u32 7, %s282_s22  ;;  %s82_s16 = scalar_lea.vmem [#allocation4], %s81_s13 }
  0x25   :  { %71 = vst.msk [vmem:[#allocation7 + $0x2] ss:$8 sm:$0x7] %vm286_vm0, %v69_v4  ;;  %v83_v5 = vld [vmem:[%s82_s16] ss:$8 sm:$0x7] }
  0x26   :  { %s190_s17 = smul.u32 24, %s89_s12  ;;  %s103_s18 = sshra.s32 %s284_s23, 3  ;;  %85 = vst.msk [vmem:[#allocation7 + $0x3] ss:$8 sm:$0x7] %vm286_vm0, %v83_v5 }
  0x27   :  { %s106_s0 = sand.u32 7, %s284_s23  ;;  %s192_s19 = smul.u32 24, %s103_s18 }
  0x28   :  { %s95_s20 = sadd.s32 %s190_s17, %s92_s15  ;;  %s193_s21 = sld [smem:[#allocation3 + $0x6]] }
  0x29   :  { %s109_s24 = sadd.s32 %s192_s19, %s106_s0  ;;  %s96_s25 = scalar_lea.vmem [#allocation4], %s95_s20 }
  0x2a   :  { %v97_v6 = vld [vmem:[%s96_s25] ss:$8 sm:$0x7]  ;;  %s195_s26 = sld [smem:[#allocation3 + $0x7]]  ;;  %s110_s22 = scalar_lea.vmem [#allocation4], %s109_s24 }
  0x2b   :  { %99 = vst.msk [vmem:[#allocation7 + $0x4] ss:$8 sm:$0x7] %vm286_vm0, %v97_v6  ;;  %v111_v7 = vld [vmem:[%s110_s22] ss:$8 sm:$0x7] }
  0x2c   :  { %113 = vst.msk [vmem:[#allocation7 + $0x5] ss:$8 sm:$0x7] %vm286_vm0, %v111_v7  ;;  %s260_s30 = smov [#allocation7]  }
  0x2d   :  { %s149_s23 = sshll.u32 %s260_s30, 4  ;;  %s150_s23 = int_to_ptr.vmem [resolvable:$true] %s149_s23 }
  0x2e   :  { %s117_s27 = sshra.s32 %s193_s21, 3  ;;  %s120_s28 = sand.u32 7, %s193_s21 }
  0x2f   :  { %s194_s29 = smul.u32 24, %s117_s27  ;;  %s230_s9 = scalar_lea.vmem %s150_s23, 384 }
  0x30   :  { %s131_s1 = sshra.s32 %s195_s26, 3  ;;  %s134_s3 = sand.u32 7, %s195_s26 }
  0x31   :  { %s123_s4 = sadd.s32 %s194_s29, %s120_s28  ;;  %s196_s5 = smul.u32 24, %s131_s1 }
  0x32   :  { %s124_s6 = scalar_lea.vmem [#allocation4], %s123_s4  ;;  %p231_p5 = scmp.ne.s32.totalorder %s150_s23, %s230_s9 }
  0x33   :  { %v125_v8 = vld [vmem:[%s124_s6] ss:$8 sm:$0x7]  ;;  %s137_s7 = sadd.s32 %s196_s5, %s134_s3  ;;  %p235_p6 = scmp.lt.s32.totalorder %s150_s23, %s150_s23 }
  0x34   :  { %127 = vst.msk [vmem:[#allocation7 + $0x6] ss:$8 sm:$0x7] %vm286_vm0, %v125_v8  ;;  %s138_s8 = scalar_lea.vmem [#allocation4], %s137_s7  ;;  %p236_p7 = scmp.lt.s32.totalorder %s230_s9, %s230_s9 }
  0x35   :  { %v139_v9 = vld [vmem:[%s138_s8] ss:$8 sm:$0x7] }
  0x36   :  { %141 = vst.msk [vmem:[#allocation7 + $0x7] ss:$8 sm:$0x7] %vm286_vm0, %v139_v9  ;;  %p237_p8 = por %p236_p7, %p235_p6 }
  0x38   :  { %p238_p9 = pnand %p237_p8, %p231_p5 }
  0x3a   :  { %241 = shalt.err (!%p238_p9)
}
  0x3b   :  { %152 = dma.vmem_to_hbm [thread:$0]  %s150_s23, 384, %s315_s2, [#allocation6]  }
  0x3c   :  { %254 = dma.done.wait [#allocation6], 384  }
  0x3d   :  { %255 = vsyncadd [#allocation6], 4294966912 }
  0x3e   :  { %156 = vsyncpa [#allocation5], 1 }
  0x3f   :  { %157 = vsyncpa [#allocation6], 1 }

// kernel: tpu_custom_call.1
= control target key start
LH: loop header
LB: loop body
LE: loop exit
PB: predicated region body
PF: predicated region fallthrough
CT: control target
= control target key end

     0   :  { %s256_s9 = smov [#allocation3]   ;;  %s313_s0 = inlined_call_operand.hbm [shape: s32[8], index: 0, kind: input, shape index: {}]   ;;  %s314_s1 = inlined_call_operand.hbm [shape: f32[56,384], index: 1, kind: input, shape index: {}]   ;;  %s315_s2 = inlined_call_operand.hbm [shape: f32[8,384], index: 2, kind: output, shape index: {}]  }
   0x1   :  { %8 = dma.hbm_to_smem %s313_s0, 16, %s256_s9, [#allocation2] }
   0x2   :  { %250 = dma.done.wait [#allocation2], 16 }
   0x3   :  { %251 = vsyncadd [#allocation2], 4294967280 }
   0x4   :  { %10 = sfence }
   0x5   :  { %11 = vsyncpa [#allocation5], 0 }
   0x6   :  { %12 = vsyncpa [#allocation6], 0  ;;  %s257_s12 = smov [#allocation4]  }
   0x7   :  { %s18_s13 = sshll.u32 %s257_s12, 4  ;;  %s19_s13 = int_to_ptr.vmem [resolvable:$true] %s18_s13 }
   0x8   :  { %s218_s14 = scalar_lea.vmem %s19_s13, 2688  ;;  %p223_p1 = scmp.lt.s32.totalorder %s19_s13, %s19_s13 }
   0x9   :  { %p219_p0 = scmp.ne.s32.totalorder %s19_s13, %s218_s14  ;;  %p224_p2 = scmp.lt.s32.totalorder %s218_s14, %s218_s14 }
   0xb   :  { %p225_p3 = por %p224_p2, %p223_p1 }
   0xd   :  { %p226_p4 = pnand %p225_p3, %p219_p0 }
   0xf   :  { %229 = shalt.err (!%p226_p4)
}
  0x10   :  { %s258_s15 = smov 384   ;;  %s259_s16 = smov 24  }
  0x11   :  { %24 = dma.hbm_to_vmem [thread:$0]  %s314_s1, 2688, %s19_s13, [#allocation5], %s258_s15, %s258_s15, %s259_s16  }
  0x12   :  { %252 = dma.done.wait [#allocation5], 2688  }
  0x13   :  { %253 = vsyncadd [#allocation5], 4294964608  ;;  %s29_s0 = sld [smem:[#allocation3]]  ;;  %v39_v0 = vlaneseq }
  0x14   :  { %s183_s19 = sld [smem:[#allocation3 + $0x1]] }
  0x15   :  { %s185_s20 = sld [smem:[#allocation3 + $0x2]]  ;;  %vm286_vm0 = vcmp.lt.s32.totalorder %v39_v0, 384 }
  0x16   :  { %s187_s21 = sld [smem:[#allocation3 + $0x3]] }
  0x17   :  { %s282_s22 = sld [smem:[#allocation3 + $0x4]] }
  0x18   :  { %s284_s23 = sld [smem:[#allocation3 + $0x5]] }
  0x19   :  { %s30_s24 = sshra.s32 %s29_s0, 3  ;;  %s33_s25 = sand.u32 7, %s29_s0 }
  0x1a   :  { %s182_s26 = smul.u32 24, %s30_s24  ;;  %s47_s27 = sshra.s32 %s183_s19, 3 }
  0x1b   :  { %s50_s28 = sand.u32 7, %s183_s19  ;;  %s184_s29 = smul.u32 24, %s47_s27 }
  0x1c   :  { %s36_s30 = sadd.s32 %s182_s26, %s33_s25  ;;  %s61_s1 = sshra.s32 %s185_s20, 3 }
  0x1d   :  { %s53_s3 = sadd.s32 %s184_s29, %s50_s28  ;;  %s37_s4 = scalar_lea.vmem [#allocation4], %s36_s30 }
  0x1e   :  { %v38_v2 = vld [vmem:[%s37_s4] ss:$8 sm:$0x7]  ;;  %s64_s5 = sand.u32 7, %s185_s20  ;;  %s54_s6 = scalar_lea.vmem [#allocation4], %s53_s3 }
  0x1f   :  { %43 = vst.msk [vmem:[#allocation7] ss:$8 sm:$0x7] %vm286_vm0, %v38_v2  ;;  %v55_v3 = vld [vmem:[%s54_s6] ss:$8 sm:$0x7] }
  0x20   :  { %s186_s7 = smul.u32 24, %s61_s1  ;;  %s75_s8 = sshra.s32 %s187_s21, 3  ;;  %57 = vst.msk [vmem:[#allocation7 + $0x1] ss:$8 sm:$0x7] %vm286_vm0, %v55_v3 }
  0x21   :  { %s78_s9 = sand.u32 7, %s187_s21  ;;  %s188_s10 = smul.u32 24, %s75_s8 }
  0x22   :  { %s67_s11 = sadd.s32 %s186_s7, %s64_s5  ;;  %s89_s12 = sshra.s32 %s282_s22, 3 }
  0x23   :  { %s81_s13 = sadd.s32 %s188_s10, %s78_s9  ;;  %s68_s14 = scalar_lea.vmem [#allocation4], %s67_s11 }
  0x24   :  { %v69_v4 = vld [vmem:[%s68_s14] ss:$8 sm:$0x7]  ;;  %s92_s15 = sand.u32 7, %s282_s22  ;;  %s82_s16 = scalar_lea.vmem [#allocation4], %s81_s13 }
  0x25   :  { %71 = vst.msk [vmem:[#allocation7 + $0x2] ss:$8 sm:$0x7] %vm286_vm0, %v69_v4  ;;  %v83_v5 = vld [vmem:[%s82_s16] ss:$8 sm:$0x7] }
  0x26   :  { %s190_s17 = smul.u32 24, %s89_s12  ;;  %s103_s18 = sshra.s32 %s284_s23, 3  ;;  %85 = vst.msk [vmem:[#allocation7 + $0x3] ss:$8 sm:$0x7] %vm286_vm0, %v83_v5 }
  0x27   :  { %s106_s0 = sand.u32 7, %s284_s23  ;;  %s192_s19 = smul.u32 24, %s103_s18 }
  0x28   :  { %s95_s20 = sadd.s32 %s190_s17, %s92_s15  ;;  %s193_s21 = sld [smem:[#allocation3 + $0x6]] }
  0x29   :  { %s109_s24 = sadd.s32 %s192_s19, %s106_s0  ;;  %s96_s25 = scalar_lea.vmem [#allocation4], %s95_s20 }
  0x2a   :  { %v97_v6 = vld [vmem:[%s96_s25] ss:$8 sm:$0x7]  ;;  %s195_s26 = sld [smem:[#allocation3 + $0x7]]  ;;  %s110_s22 = scalar_lea.vmem [#allocation4], %s109_s24 }
  0x2b   :  { %99 = vst.msk [vmem:[#allocation7 + $0x4] ss:$8 sm:$0x7] %vm286_vm0, %v97_v6  ;;  %v111_v7 = vld [vmem:[%s110_s22] ss:$8 sm:$0x7] }
  0x2c   :  { %113 = vst.msk [vmem:[#allocation7 + $0x5] ss:$8 sm:$0x7] %vm286_vm0, %v111_v7  ;;  %s260_s30 = smov [#allocation7]  }
  0x2d   :  { %s149_s23 = sshll.u32 %s260_s30, 4  ;;  %s150_s23 = int_to_ptr.vmem [resolvable:$true] %s149_s23 }
  0x2e   :  { %s117_s27 = sshra.s32 %s193_s21, 3  ;;  %s120_s28 = sand.u32 7, %s193_s21 }
  0x2f   :  { %s194_s29 = smul.u32 24, %s117_s27  ;;  %s230_s9 = scalar_lea.vmem %s150_s23, 384 }
  0x30   :  { %s131_s1 = sshra.s32 %s195_s26, 3  ;;  %s134_s3 = sand.u32 7, %s195_s26 }
  0x31   :  { %s123_s4 = sadd.s32 %s194_s29, %s120_s28  ;;  %s196_s5 = smul.u32 24, %s131_s1 }
  0x32   :  { %s124_s6 = scalar_lea.vmem [#allocation4], %s123_s4  ;;  %p231_p5 = scmp.ne.s32.totalorder %s150_s23, %s230_s9 }
  0x33   :  { %v125_v8 = vld [vmem:[%s124_s6] ss:$8 sm:$0x7]  ;;  %s137_s7 = sadd.s32 %s196_s5, %s134_s3  ;;  %p235_p6 = scmp.lt.s32.totalorder %s150_s23, %s150_s23 }
  0x34   :  { %127 = vst.msk [vmem:[#allocation7 + $0x6] ss:$8 sm:$0x7] %vm286_vm0, %v125_v8  ;;  %s138_s8 = scalar_lea.vmem [#allocation4], %s137_s7  ;;  %p236_p7 = scmp.lt.s32.totalorder %s230_s9, %s230_s9 }
  0x35   :  { %v139_v9 = vld [vmem:[%s138_s8] ss:$8 sm:$0x7] }
  0x36   :  { %141 = vst.msk [vmem:[#allocation7 + $0x7] ss:$8 sm:$0x7] %vm286_vm0, %v139_v9  ;;  %p237_p8 = por %p236_p7, %p235_p6 }
  0x38   :  { %p238_p9 = pnand %p237_p8, %p231_p5 }
  0x3a   :  { %241 = shalt.err (!%p238_p9)
}
  0x3b   :  { %152 = dma.vmem_to_hbm [thread:$0]  %s150_s23, 384, %s315_s2, [#allocation6]  }
  0x3c   :  { %254 = dma.done.wait [#allocation6], 384  }
  0x3d   :  { %255 = vsyncadd [#allocation6], 4294966912 }
  0x3e   :  { %156 = vsyncpa [#allocation5], 1 }
  0x3f   :  { %157 = vsyncpa [#allocation6], 1 }

</bundles_post_ra>
